<compile_context>
chip_gen: v6e
topology: v6e:2x2x1
jax: 0.10.0
libtpu: 0.0.40
codegen_flags: <defaults>
</compile_context>

<pallas_src>
import functools

import jax
import jax.numpy as jnp
import numpy as np
from jax.experimental import pallas as pl
from jax.experimental.pallas import tpu as pltpu


def _round_up(x, m):
    return ((x + m - 1) // m) * m


def _sss_loss_kernel(xt_ref, xp_ref, rhs_ref, out_ref, *,
                     n_freq, half, n_frames, tile_frames, eps):
    # xt_ref / xp_ref: (1, tile_frames, k_pad) f32 framed audio (true / pred)
    # rhs_ref:         (k_pad, 2*half) f32, [wc | ws] windowed+normalized bases
    # out_ref:         (1, 8, 2*half) f32 per-batch per-lane partial sums:
    #                  row 0 = sum(diff^2), row 1 = sum(ssum^2), row 2 = sum|dlog|
    f = pl.program_id(1)
    nlanes = 2 * half
    rhs = rhs_ref[...]

    def spectrogram(x):
        # One fused MXU matmul gives [re | im]; roll by half lanes to pair them.
        y = jnp.dot(x, rhs, preferred_element_type=jnp.float32)   # (tf, nlanes)
        sq = y * y
        power = sq + pltpu.roll(sq, shift=half, axis=1)           # re^2 + im^2
        return jnp.sqrt(power) + eps                              # power=1 magnitude

    st = spectrogram(xt_ref[0])
    sp = spectrogram(xp_ref[0])

    # Mask: count each valid (frame, freq) element exactly once
    # (duplicate lanes >= half and zero-padded lanes/rows contribute 0).
    col = jax.lax.broadcasted_iota(jnp.int32, (tile_frames, nlanes), 1)
    row = jax.lax.broadcasted_iota(jnp.int32, (tile_frames, nlanes), 0)
    valid_rows = n_frames - f * tile_frames
    mask = jnp.where((col < n_freq) & (row < valid_rows), 1.0, 0.0)

    diff = st - sp
    ssum = st + sp
    dlog = jnp.abs(jnp.log(st) - jnp.log(sp))

    num_cols = jnp.sum(mask * diff * diff, axis=0, keepdims=True)   # (1, nlanes)
    den_cols = jnp.sum(mask * ssum * ssum, axis=0, keepdims=True)
    log_cols = jnp.sum(mask * dlog, axis=0, keepdims=True)

    # Pack the three per-lane partial sums into rows 0..2 of an (8, nlanes) tile.
    row8 = jax.lax.broadcasted_iota(jnp.int32, (8, nlanes), 0)
    update = (jnp.where(row8 == 0, num_cols, 0.0)
              + jnp.where(row8 == 1, den_cols, 0.0)
              + jnp.where(row8 == 2, log_cols, 0.0))

    @pl.when(f == 0)
    def _init():
        out_ref[...] = jnp.zeros_like(out_ref)

    out_ref[0] = out_ref[0] + update


def _dft_rhs(n_fft, k_pad, half):
    """Windowed, normalized one-sided DFT bases packed as [wc | ws], lane-dense."""
    n_freq = n_fft // 2 + 1
    n = np.arange(n_fft, dtype=np.float64)
    fr = np.arange(n_freq, dtype=np.float64)
    # torch.hann_window(n_fft, periodic=True)
    window = 0.5 * (1.0 - np.cos(2.0 * np.pi * n / n_fft))
    norm = np.sqrt(np.sum(window * window))       # normalized=True ("window")
    phase = 2.0 * np.pi * np.outer(n, fr) / n_fft
    wc = (window[:, None] * np.cos(phase)) / norm
    ws = (window[:, None] * np.sin(phase)) / norm  # sign irrelevant for |.|
    rhs = np.zeros((k_pad, 2 * half), dtype=np.float32)
    rhs[:n_fft, :n_freq] = wc
    rhs[:n_fft, half:half + n_freq] = ws
    return jnp.asarray(rhs)


def sss_loss(x_true, x_pred, n_fft=111, alpha=1.0, overlap=0.0, eps=1e-7,
             tile_frames=256):
    hop = int(n_fft * (1 - overlap))
    n_freq = n_fft // 2 + 1
    xt = x_true.astype(jnp.float32)
    xp = x_pred.astype(jnp.float32)
    B, T = xt.shape
    n_frames = 1 + (T - n_fft) // hop

    def frame(x):
        if hop == n_fft:  # overlap=0: frames are contiguous -> free reshape
            return x[:, :n_frames * n_fft].reshape(B, n_frames, n_fft)
        idx = jnp.arange(n_frames)[:, None] * hop + jnp.arange(n_fft)[None, :]
        return x[:, idx]

    ft = frame(xt)
    fp = frame(xp)

    # Lane / sublane-friendly padding.
    k_pad = _round_up(n_fft, 128)
    half = _round_up(n_freq, 64)          # [wc | ws] halves; 2*half % 128 == 0
    nlanes = 2 * half
    tile_frames = max(8, min(tile_frames, _round_up(n_frames, 8)))
    tile_frames = _round_up(tile_frames, 8)
    nf_pad = _round_up(n_frames, tile_frames)

    pad3 = ((0, 0), (0, nf_pad - n_frames), (0, k_pad - n_fft))
    ft = jnp.pad(ft, pad3)
    fp = jnp.pad(fp, pad3)
    rhs = _dft_rhs(n_fft, k_pad, half)

    kernel = functools.partial(
        _sss_loss_kernel, n_freq=n_freq, half=half, n_frames=n_frames,
        tile_frames=tile_frames, eps=float(eps))

    n_blocks = nf_pad // tile_frames
    partials = pl.pallas_call(
        kernel,
        out_shape=jax.ShapeDtypeStruct((B, 8, nlanes), jnp.float32),
        grid=(B, n_blocks),
        in_specs=[
            pl.BlockSpec((1, tile_frames, k_pad), lambda b, f: (b, f, 0)),
            pl.BlockSpec((1, tile_frames, k_pad), lambda b, f: (b, f, 0)),
            pl.BlockSpec((k_pad, nlanes), lambda b, f: (0, 0)),
        ],
        out_specs=pl.BlockSpec((1, 8, nlanes), lambda b, f: (b, 0, 0)),
        compiler_params=pltpu.CompilerParams(
            dimension_semantics=("parallel", "arbitrary")),
    )(ft, fp, rhs)

    # Final scalar combine (a handful of ops) in plain JAX.
    num = jnp.sum(partials[:, 0, :], axis=-1)      # (B,) sum(diff^2)
    den = jnp.sum(partials[:, 1, :], axis=-1)      # (B,) sum(ssum^2)
    logsum = jnp.sum(partials[:, 2, :])            # scalar sum |log st - log sp|
    converge_term = jnp.mean(jnp.sqrt(num) / jnp.sqrt(den))
    log_term = logsum / (B * n_frames * n_freq)
    return converge_term + alpha * log_term


def _sss_loss_ref(x_true, x_pred, n_fft=111, alpha=1.0, overlap=0.0, eps=1e-7):
    """Pure-JAX reference (same math as the torch module), unpadded."""
    hop = int(n_fft * (1 - overlap))
    xt = x_true.astype(jnp.float32)
    xp = x_pred.astype(jnp.float32)
    B, T = xt.shape
    n_frames = 1 + (T - n_fft) // hop
    idx = jnp.arange(n_frames)[:, None] * hop + jnp.arange(n_fft)[None, :]
    ft, fpred = xt[:, idx], xp[:, idx]

    n_freq = n_fft // 2 + 1
    n = np.arange(n_fft, dtype=np.float64)
    fr = np.arange(n_freq, dtype=np.float64)
    window = 0.5 * (1.0 - np.cos(2.0 * np.pi * n / n_fft))
    norm = np.sqrt(np.sum(window * window))
    phase = 2.0 * np.pi * np.outer(n, fr) / n_fft
    wc = jnp.asarray(window[:, None] * np.cos(phase) / norm, jnp.float32)
    ws = jnp.asarray(window[:, None] * np.sin(phase) / norm, jnp.float32)

    def spec(frames):
        re = jnp.einsum("bfk,kn->bfn", frames, wc,
                        preferred_element_type=jnp.float32)
        im = jnp.einsum("bfk,kn->bfn", frames, ws,
                        preferred_element_type=jnp.float32)
        return jnp.sqrt(re * re + im * im) + eps

    st, sp = spec(ft), spec(fpred)
    num = jnp.sqrt(jnp.sum((st - sp) ** 2, axis=(1, 2)))
    den = jnp.sqrt(jnp.sum((st + sp) ** 2, axis=(1, 2)))
    converge = jnp.mean(num / den)
    log_term = jnp.mean(jnp.abs(jnp.log(st) - jnp.log(sp)))
    return converge + alpha * log_term


if __name__ == "__main__":
    n_fft = 111
    n_frames = 64
    B = 2
    T = n_fft * n_frames  # 7104 samples -> 64 non-overlapping frames

    key = jax.random.PRNGKey(0)
    k1, k2 = jax.random.split(key)
    x_true = jax.random.normal(k1, (B, T), dtype=jnp.float32)
    x_pred = x_true + 0.1 * jax.random.normal(k2, (B, T), dtype=jnp.float32)

    # Small tile_frames here to exercise the multi-block accumulation path.
    loss = sss_loss(x_true, x_pred, n_fft=n_fft, tile_frames=16)
    loss = jax.block_until_ready(loss)

    loss_ref = jax.block_until_ready(_sss_loss_ref(x_true, x_pred, n_fft=n_fft))
    np.testing.assert_allclose(np.asarray(loss), np.asarray(loss_ref),
                               rtol=2e-4, atol=2e-5)
    print("KERNEL_OK")
</pallas_src>

<mosaic_0001>
module attributes {stable_mosaic.version = 11 : i64} {
  func.func @_sss_loss_kernel(%arg0: i32, %arg1: i32, %arg2: memref<1x16x128xf32, #tpu.memory_space<vmem>>, %arg3: memref<1x16x128xf32, #tpu.memory_space<vmem>>, %arg4: memref<128x128xf32, #tpu.memory_space<vmem>>, %arg5: memref<1x8x128xf32, #tpu.memory_space<vmem>>) attributes {dimension_semantics = [#tpu.dimension_semantics<parallel>, #tpu.dimension_semantics<arbitrary>], iteration_bounds = array<i64: 2, 4>, scalar_prefetch = 0 : i64, scratch_operands = 0 : i64, tpu.core_type = #tpu.core_type<tc>, window_params = [{transform_indices = @transform_0, window_bounds = array<i64: 1, 16, 128>}, {transform_indices = @transform_1, window_bounds = array<i64: 1, 16, 128>}, {pipeline_mode = #tpu.pipeline_mode<synchronous>, transform_indices = @transform_2, window_bounds = array<i64: 128, 128>}, {transform_indices = @transform_3, window_bounds = array<i64: 1, 8, 128>}]} {
    %c0 = arith.constant 0 : index
    %c0_0 = arith.constant 0 : index
    %0 = vector.load %arg4[%c0, %c0_0] : memref<128x128xf32, #tpu.memory_space<vmem>>, vector<128x128xf32>
    %c0_1 = arith.constant 0 : index
    %c0_2 = arith.constant 0 : index
    %c0_3 = arith.constant 0 : index
    %1 = vector.load %arg2[%c0_1, %c0_2, %c0_3] : memref<1x16x128xf32, #tpu.memory_space<vmem>>, vector<1x16x128xf32>
    %2 = vector.shape_cast %1 : vector<1x16x128xf32> to vector<16x128xf32>
    %cst = arith.constant dense<0.000000e+00> : vector<16x128xf32>
    %3 = tpu.matmul %2, %0, %cst {dimension_numbers = #tpu.dot_dimension_numbers<[1], [0], [0], [1], [0, 0, 1, 1], [], []>} : vector<16x128xf32>, vector<128x128xf32>, vector<16x128xf32> -> vector<16x128xf32>
    %4 = arith.mulf %3, %3 : vector<16x128xf32>
    %c64_i32 = arith.constant 64 : i32
    %5 = tpu.dynamic_rotate %4 by %c64_i32 dim 1 : vector<16x128xf32>, i32 -> vector<16x128xf32>
    %6 = arith.addf %4, %5 : vector<16x128xf32>
    %7 = math.sqrt %6 : vector<16x128xf32>
    %cst_4 = arith.constant 1.000000e-07 : f32
    %8 = vector.broadcast %cst_4 : f32 to vector<16x128xf32>
    %9 = arith.addf %7, %8 : vector<16x128xf32>
    %c0_5 = arith.constant 0 : index
    %c0_6 = arith.constant 0 : index
    %c0_7 = arith.constant 0 : index
    %10 = vector.load %arg3[%c0_5, %c0_6, %c0_7] : memref<1x16x128xf32, #tpu.memory_space<vmem>>, vector<1x16x128xf32>
    %11 = vector.shape_cast %10 : vector<1x16x128xf32> to vector<16x128xf32>
    %cst_8 = arith.constant dense<0.000000e+00> : vector<16x128xf32>
    %12 = tpu.matmul %11, %0, %cst_8 {dimension_numbers = #tpu.dot_dimension_numbers<[1], [0], [0], [1], [0, 0, 1, 1], [], []>} : vector<16x128xf32>, vector<128x128xf32>, vector<16x128xf32> -> vector<16x128xf32>
    %13 = arith.mulf %12, %12 : vector<16x128xf32>
    %c64_i32_9 = arith.constant 64 : i32
    %14 = tpu.dynamic_rotate %13 by %c64_i32_9 dim 1 : vector<16x128xf32>, i32 -> vector<16x128xf32>
    %15 = arith.addf %13, %14 : vector<16x128xf32>
    %16 = math.sqrt %15 : vector<16x128xf32>
    %cst_10 = arith.constant 1.000000e-07 : f32
    %17 = vector.broadcast %cst_10 : f32 to vector<16x128xf32>
    %18 = arith.addf %16, %17 : vector<16x128xf32>
    %19 = tpu.iota {dimensions = array<i32: 1>} : vector<16x128xi32>
    %20 = tpu.iota {dimensions = array<i32: 0>} : vector<16x128xi32>
    %c16_i32 = arith.constant 16 : i32
    %21 = arith.muli %arg1, %c16_i32 : i32
    %c64_i32_11 = arith.constant 64 : i32
    %22 = arith.subi %c64_i32_11, %21 : i32
    %c56_i32 = arith.constant 56 : i32
    %23 = vector.broadcast %c56_i32 : i32 to vector<16x128xi32>
    %24 = arith.cmpi slt, %19, %23 : vector<16x128xi32>
    %25 = vector.broadcast %22 : i32 to vector<16x128xi32>
    %26 = arith.cmpi slt, %20, %25 : vector<16x128xi32>
    %27 = arith.andi %24, %26 : vector<16x128xi1>
    %cst_12 = arith.constant 1.000000e+00 : f32
    %cst_13 = arith.constant 0.000000e+00 : f32
    %28 = vector.broadcast %cst_12 : f32 to vector<16x128xf32>
    %29 = vector.broadcast %cst_13 : f32 to vector<16x128xf32>
    %30 = arith.select %27, %28, %29 : vector<16x128xi1>, vector<16x128xf32>
    %31 = arith.subf %9, %18 : vector<16x128xf32>
    %32 = arith.addf %9, %18 : vector<16x128xf32>
    %33 = math.log %9 : vector<16x128xf32>
    %34 = math.log %18 : vector<16x128xf32>
    %35 = arith.subf %33, %34 : vector<16x128xf32>
    %36 = math.absf %35 : vector<16x128xf32>
    %37 = arith.mulf %30, %31 : vector<16x128xf32>
    %38 = arith.mulf %37, %31 : vector<16x128xf32>
    %cst_14 = arith.constant dense<0.000000e+00> : vector<128xf32>
    %39 = vector.multi_reduction <add>, %38, %cst_14 [0] : vector<16x128xf32> to vector<128xf32>
    %40 = vector.shape_cast %39 : vector<128xf32> to vector<1x128xf32>
    %41 = arith.mulf %30, %32 : vector<16x128xf32>
    %42 = arith.mulf %41, %32 : vector<16x128xf32>
    %cst_15 = arith.constant dense<0.000000e+00> : vector<128xf32>
    %43 = vector.multi_reduction <add>, %42, %cst_15 [0] : vector<16x128xf32> to vector<128xf32>
    %44 = vector.shape_cast %43 : vector<128xf32> to vector<1x128xf32>
    %45 = arith.mulf %30, %36 : vector<16x128xf32>
    %cst_16 = arith.constant dense<0.000000e+00> : vector<128xf32>
    %46 = vector.multi_reduction <add>, %45, %cst_16 [0] : vector<16x128xf32> to vector<128xf32>
    %47 = vector.shape_cast %46 : vector<128xf32> to vector<1x128xf32>
    %48 = tpu.iota {dimensions = array<i32: 0>} : vector<8x128xi32>
    %c0_i32 = arith.constant 0 : i32
    %49 = vector.broadcast %c0_i32 : i32 to vector<8x128xi32>
    %50 = arith.cmpi eq, %48, %49 : vector<8x128xi32>
    %cst_17 = arith.constant 0.000000e+00 : f32
    %51 = vector.shape_cast %40 : vector<1x128xf32> to vector<1x128xf32>
    %52 = vector.broadcast %51 : vector<1x128xf32> to vector<8x128xf32>
    %53 = vector.broadcast %cst_17 : f32 to vector<8x128xf32>
    %54 = arith.select %50, %52, %53 : vector<8x128xi1>, vector<8x128xf32>
    %c1_i32 = arith.constant 1 : i32
    %55 = vector.broadcast %c1_i32 : i32 to vector<8x128xi32>
    %56 = arith.cmpi eq, %48, %55 : vector<8x128xi32>
    %cst_18 = arith.constant 0.000000e+00 : f32
    %57 = vector.shape_cast %44 : vector<1x128xf32> to vector<1x128xf32>
    %58 = vector.broadcast %57 : vector<1x128xf32> to vector<8x128xf32>
    %59 = vector.broadcast %cst_18 : f32 to vector<8x128xf32>
    %60 = arith.select %56, %58, %59 : vector<8x128xi1>, vector<8x128xf32>
    %61 = arith.addf %54, %60 : vector<8x128xf32>
    %c2_i32 = arith.constant 2 : i32
    %62 = vector.broadcast %c2_i32 : i32 to vector<8x128xi32>
    %63 = arith.cmpi eq, %48, %62 : vector<8x128xi32>
    %cst_19 = arith.constant 0.000000e+00 : f32
    %64 = vector.shape_cast %47 : vector<1x128xf32> to vector<1x128xf32>
    %65 = vector.broadcast %64 : vector<1x128xf32> to vector<8x128xf32>
    %66 = vector.broadcast %cst_19 : f32 to vector<8x128xf32>
    %67 = arith.select %63, %65, %66 : vector<8x128xi1>, vector<8x128xf32>
    %68 = arith.addf %61, %67 : vector<8x128xf32>
    %c0_i32_20 = arith.constant 0 : i32
    %69 = arith.cmpi eq, %arg1, %c0_i32_20 : i32
    %70 = arith.extui %69 : i1 to i32
    %c0_i32_21 = arith.constant 0 : i32
    %71 = arith.cmpi ne, %70, %c0_i32_21 : i32
    scf.if %71 {
      %cst_28 = arith.constant 0.000000e+00 : f32
      %78 = vector.broadcast %cst_28 : f32 to vector<1x8x128xf32>
      %c0_29 = arith.constant 0 : index
      %c0_30 = arith.constant 0 : index
      %c0_31 = arith.constant 0 : index
      %79 = vector.load %arg5[%c0_29, %c0_30, %c0_31] : memref<1x8x128xf32, #tpu.memory_space<vmem>>, vector<1x8x128xf32>
      tpu.vector_store %arg5[%c0_29, %c0_30, %c0_31], %78 {strides = array<i32>} : memref<1x8x128xf32, #tpu.memory_space<vmem>>, vector<1x8x128xf32>,
    } else {
    }
    %c0_22 = arith.constant 0 : index
    %c0_23 = arith.constant 0 : index
    %c0_24 = arith.constant 0 : index
    %72 = vector.load %arg5[%c0_22, %c0_23, %c0_24] : memref<1x8x128xf32, #tpu.memory_space<vmem>>, vector<1x8x128xf32>
    %73 = vector.shape_cast %72 : vector<1x8x128xf32> to vector<8x128xf32>
    %74 = arith.addf %73, %68 : vector<8x128xf32>
    %c0_25 = arith.constant 0 : index
    %c0_26 = arith.constant 0 : index
    %c0_27 = arith.constant 0 : index
    %75 = vector.load %arg5[%c0_25, %c0_26, %c0_27] : memref<1x8x128xf32, #tpu.memory_space<vmem>>, vector<1x8x128xf32>
    %76 = vector.shape_cast %75 : vector<1x8x128xf32> to vector<8x128xf32>
    %77 = vector.shape_cast %74 : vector<8x128xf32> to vector<1x8x128xf32>
    tpu.vector_store %arg5[%c0_25, %c0_26, %c0_27], %77 {strides = array<i32>} : memref<1x8x128xf32, #tpu.memory_space<vmem>>, vector<1x8x128xf32>,
    return
  }
  func.func @transform_0(%arg0: i32, %arg1: i32) -> (i32, i32, i32) {
    %c0_i32 = arith.constant 0 : i32
    %c0_i32_0 = arith.constant 0 : i32
    return %arg0, %arg1, %c0_i32 : i32, i32, i32
  }
  func.func @transform_1(%arg0: i32, %arg1: i32) -> (i32, i32, i32) {
    %c0_i32 = arith.constant 0 : i32
    %c0_i32_0 = arith.constant 0 : i32
    return %arg0, %arg1, %c0_i32 : i32, i32, i32
  }
  func.func @transform_2(%arg0: i32, %arg1: i32) -> (i32, i32) {
    %c0_i32 = arith.constant 0 : i32
    %c0_i32_0 = arith.constant 0 : i32
    %c0_i32_1 = arith.constant 0 : i32
    return %c0_i32, %c0_i32_0 : i32, i32
  }
  func.func @transform_3(%arg0: i32, %arg1: i32) -> (i32, i32, i32) {
    %c0_i32 = arith.constant 0 : i32
    %c0_i32_0 = arith.constant 0 : i32
    %c0_i32_1 = arith.constant 0 : i32
    return %arg0, %c0_i32, %c0_i32_0 : i32, i32, i32
  }
}

</mosaic_0001>

<bundles_post_ra>
// kernel: tpu_custom_call.1
= control target key start
LH: loop header
LB: loop body
LE: loop exit
PB: predicated region body
PF: predicated region fallthrough
CT: control target
= control target key end

     0   :  { %s1482_s0 = inlined_call_operand.hbm [shape: f32[2,64,128], index: 0, kind: input, shape index: {}]   ;;  %s1483_s1 = inlined_call_operand.hbm [shape: f32[2,64,128], index: 1, kind: input, shape index: {}]   ;;  %s1484_s2 = inlined_call_operand.hbm [shape: f32[128,128], index: 2, kind: input, shape index: {}]   ;;  %s1485_s3 = inlined_call_operand.hbm [shape: f32[2,8,128], index: 3, kind: output, shape index: {}]  }
   0x1   :  { %1498 = sst [smem:[#allocation19_spill]] %s1484_s2 }
   0x2   :  { %1499 = sst [smem:[#allocation20_spill]] %s1485_s3 }
   0x3   :  { %8 = vsyncpa [#allocation3], 0 }
   0x4   :  { %10 = vsyncpa [#allocation3 + $0x1], 0 }
   0x5   :  { %11 = vsyncpa [#allocation6], 0 }
   0x6   :  { %13 = vsyncpa [#allocation6 + $0x1], 0 }
   0x7   :  { %14 = vsyncpa [#allocation4], 0 }
   0x8   :  { %16 = vsyncpa [#allocation4 + $0x1], 0  ;;  %s1204_s12 = smov 0   ;;  %s1206_s13 = smov 0  }
   0x9   :  { %s1208_s14 = smov 0   ;;  %s1210_s15 = smov 0  }
   0xa   :  { %s1212_s16 = smov 0   ;;  %s1214_s17 = smov 0  }
   0xb   :  { %s1216_s18 = smov 0   ;;  %s1218_s19 = smov 0  }
   0xc   :  { %s1220_s20 = smov 0   ;;  %s1222_s21 = smov 0  }
   0xd   :  { %s1224_s22 = smov 0  }
   0xe LB: > { %1500 = sst [smem:[#allocation13_spill]] %s1133_s12  ;;  %s1258_s23 = sadd.s32 4294967295, %s1173_s22   ;;  %s1173_s22 = sphi %s1224_s22, %s22_s22   ;;  %s1169_s21 = sphi %s1222_s21, %s1535_s21   ;;  %s1165_s20 = sphi %s1220_s20, %s1534_s20   ;;  %s1161_s19 = sphi %s1218_s19, %s1533_s19   ;;  %s1157_s18 = sphi %s1216_s18, %s1532_s18   ;;  %s1153_s17 = sphi %s1214_s17, %s1531_s17   ;;  %s1149_s16 = sphi %s1212_s16, %s1530_s16   ;;  %s1145_s15 = sphi %s1210_s15, %s1529_s15   ;;  %s1141_s14 = sphi %s1208_s14, %s1528_s14   ;;  %s1137_s13 = sphi %s1206_s13, %s1527_s13   ;;  %s1133_s12 = sphi %s1204_s12, %s1526_s12  }
   0xf   : > { %1501 = sst [smem:[#allocation14_spill]] %s1161_s19  ;;  %s695_s24 = sadd.s32 4294967294, %s1173_s22  }
  0x10   : > { %p56_p0 = scmp.ne.s32.totalorder %s1149_s16, %s1145_s15  ;;  %p57_p1 = scmp.eq.s32.totalorder %s1258_s23, 0 }
  0x11   : > { %s118_s25 = sadd.s32 1, %s1141_s14  ;;  %p128_p2 = scmp.ne.s32.totalorder %s1141_s14, %s1137_s13 }
  0x12   : > { %p1268_p3 = por %p57_p1, %p56_p0  ;;  %p129_p4 = scmp.eq.s32.totalorder %s1258_s23, 7 }
  0x13   : > { %p134_p5 = scmp.ne.s32.totalorder %s1137_s13, %s1133_s12  ;;  %p135_p6 = scmp.eq.s32.totalorder %s695_s24, 7 }
  0x14   : > { %p1275_p7 = por %p129_p4, %p128_p2  ;;  %p696_p8 = scmp.ge.s32.totalorder %s1173_s22, 1 }
  0x15   : > { %p1280_p9 = por %p135_p6, %p134_p5  ;;  %p142_p10 = scmp.lt.s32.totalorder %s1173_s22, 9 }
  0x16   : > { %s1503_s27 = scalar_select %p1275_p7, 1, 0 }
  0x17   : > { %s1505_s28 = scalar_select %p1280_p9, 1, 0 }
  0x18   : > { %1504 = sst [smem:[#allocation15_spill]] %s1503_s27  ;;  %p1285_p11 = pnand %p696_p8, %p142_p10 }
  0x19   : > { %1506 = sst [smem:[#allocation16_spill]] %s1505_s28  ;;  %s1175_s30 = smov [#allocation7]  }
  0x1a   : > { %s154_s4 = sshll.u32 %s1175_s30, 4  ;;  %p834_p12 = pneg %p1285_p11  ;;  %s155_s4 = int_to_ptr.vmem [resolvable:$true] %s154_s4 }
  0x1b   : > { %s974_s5 = scalar_lea.vmem %s155_s4, 2048  ;;  %p982_p6 = scmp.lt.s32.totalorder %s155_s4, %s155_s4 }
  0x1c   : > { %p835_p13 = pnand %p834_p12, %p57_p1  ;;  %p975_p2 = scmp.ne.s32.totalorder %s155_s4, %s974_s5 }
  0x1d   : > { %p983_p9 = scmp.lt.s32.totalorder %s974_s5, %s974_s5 }
  0x1e   : > { %p965_p0 = pneg %p835_p13 }
  0x1f   : > { %p984_p7 = por %p983_p9, %p982_p6 }
  0x20   : > { %p977_p4 = pnand %p975_p2, %p965_p0 }
  0x22   : > { %p978_p5 = pneg %p977_p4 }
  0x24   : > { %p985_p8 = pnand %p984_p7, %p978_p5 }
  0x26   : > { %988 = shalt.err (!%p985_p8)
}
  0x27   : > { %s1487_s6 = smov 128   ;;  %s1489_s7 = smov 8  }
  0x28   : > { %s1508_s2 = sld [smem:[#allocation19_spill]]  ;;  %s31_s10 = sadd.s32 1, %s1165_s20 }
  0x29   : > { %p32_p7 = scmp.ge.s32.totalorder %s31_s10, 4  ;;  %s34_s11 = sadd.s32 1, %s1169_s21 }
  0x2a   : > { %s43_s15 = sadd.s32 1, %s1153_s17  ;;  %p50_p9 = scmp.ne.s32.totalorder %s1153_s17, %s1149_s16 }
  0x2b   : > { %s1537_s10 = smov (%p32_p7, %s31_s10), 0  ;;  %s1539_s11 = smov (!%p32_p7, %s34_s11), %s1169_s21 }
  0x2c   : > { %1509 = sst [smem:[#allocation17_spill]] %s1537_s10  ;;  %s39_s24 = ssub.s32 %s1165_s20, %s1537_s10 }
  0x2d   : > { %p51_p10 = scmp.eq.s32.totalorder %s1173_s22, 0  ;;  %p36_p12 = scmp.ge.s32.totalorder %s1539_s11, 2 }
  0x2e   : > { %837 = dma.hbm_to_vmem [thread:$0]  (!%p835_p13), %s1508_s2, 2048, %s155_s4, [#allocation6], %s1487_s6, %s1487_s6, %s1489_s7  }
  0x2f   : > { %p850_p0 = scmp.lt.s32.totalorder %s1173_s22, 8  ;;  %p1311_p13 = por %p51_p10, %p50_p9 }
  0x30   : > { %s168_s4 = sand.u32 1, %s1153_s17   ;;  %s1541_s11 = smov (%p36_p12, %s1539_s11), 0 }
  0x31   : > { %1511 = sst [smem:[#allocation18_spill]] %s1541_s11  ;;  %s1318_s5 = sshll.u32 %s168_s4, 4 }
  0x32   : > { %s38_s8 = ssub.s32 %s1169_s21, %s1541_s11  ;;  %s700_s6 = sshll.u32 %s1165_s20, 1 }
  0x33   : > { %s40_s9 = sor.u32 %s39_s24, %s38_s8  ;;  %p116_p2 = scmp.eq.s32.totalorder %s38_s8, 0 }
  0x34   : > { %p41_p4 = scmp.eq.s32.totalorder %s40_s9, 0  ;;  %s701_s10 = sshll.u32 %s1169_s21, 3 }
  0x35   : > { %s1326_s7 = scalar_select %p116_p2, %s1141_s14, %s118_s25  }
  0x36   : > { %s1329_s2 = scalar_select %p41_p4, %s1153_s17, %s43_s15  }
  0x37   : > { %s172_s28 = scalar_lea.vmem [#allocation2], %s1318_s5  ;;  %s178_s3 = sadd.s32 %s701_s10, %s700_s6 }
  0x38   : > { %s181_s12 = sshll.u32 %s172_s28, 4  ;;  %s702_s27 = sshll.u32 %s178_s3, 7  ;;  %s182_s12 = int_to_ptr.vmem [resolvable:$true] %s181_s12 }
  0x39   : > { %p1337_p5 = pnand %p850_p0, %p1311_p13  ;;  %s180_s25 = scalar_lea.hbm %s1482_s0, %s702_s27 }
  0x3a   : > { %s1347_s11 = scalar_lea.hbm %s1483_s1, %s702_s27  ;;  %s169_s28 = scalar_lea.sflag [#allocation3], %s168_s4 }
  0x3b   : > { %p991_p6 = pneg %p1337_p5  ;;  %s1002_s3 = scalar_lea.vmem %s182_s12, 256 }
  0x3c   : > { %p1003_p8 = scmp.ne.s32.totalorder %s182_s12, %s1002_s3  ;;  %s1178_s6 = smov [#allocation2]  }
  0x3d   : > { %s1007_s10 = sshll.u32 %s1178_s6, 4  ;;  %s1008_s10 = int_to_ptr.vmem [resolvable:$false] %s1007_s10 }
  0x3e   : > { %p1005_p7 = pnand %p1003_p8, %p991_p6  ;;  %s1009_s30 = scalar_lea.vmem %s1008_s10, 512 }
  0x3f   : > { %p1010_p10 = scmp.lt.s32.totalorder %s182_s12, %s1008_s10  ;;  %p1011_p12 = scmp.lt.s32.totalorder %s1009_s30, %s1002_s3 }
  0x40   : > { %p1006_p9 = pneg %p1005_p7 }
  0x41   : > { %p1012_p0 = por %p1011_p12, %p1010_p10 }
  0x43   : > { %p1013_p13 = pnand %p1012_p0, %p1006_p9 }
  0x45   : > { %1016 = shalt.err (!%p1013_p13)
}
  0x46   : > { %s1513_s27 = smov 8   ;;  %s1514_s4 = smov 128  }
  0x47   : > { %841 = dma.hbm_to_vmem [thread:$0]  (!%p1337_p5), %s180_s25, 256, %s182_s12, %s169_s28, %s1514_s4, %s1514_s4, %s1513_s27  }
  0x48   : > { %s195_s24 = scalar_lea.vmem [#allocation5], %s1318_s5  ;;  %s191_s15 = sand.u32 1, %s1173_s22  }
  0x49   : > { %s204_s8 = sshll.u32 %s195_s24, 4  ;;  %s192_s9 = scalar_lea.sflag [#allocation6], %s191_s15  ;;  %s205_s8 = int_to_ptr.vmem [resolvable:$true] %s204_s8 }
  0x4a   : > { %s1030_s6 = scalar_lea.vmem %s205_s8, 256  ;;  %s1179_s3 = smov [#allocation5]  }
  0x4b   : > { %p1031_p2 = scmp.ne.s32.totalorder %s205_s8, %s1030_s6  ;;  %s1035_s10 = sshll.u32 %s1179_s3, 4  ;;  %s1036_s10 = int_to_ptr.vmem [resolvable:$false] %s1035_s10 }
  0x4c   : > { %s1037_s30 = scalar_lea.vmem %s1036_s10, 512  ;;  %p1038_p7 = scmp.lt.s32.totalorder %s205_s8, %s1036_s10 }
  0x4d   : > { %p1033_p4 = pnand %p1031_p2, %p991_p6  ;;  %p1039_p9 = scmp.lt.s32.totalorder %s1037_s30, %s1030_s6 }
  0x4f   : > { %p1034_p8 = pneg %p1033_p4  ;;  %p1040_p10 = por %p1039_p9, %p1038_p7 }
  0x51   : > { %p1041_p12 = pnand %p1040_p10, %p1034_p8 }
  0x53   : > { %1044 = shalt.err (!%p1041_p12)
}
  0x54   : > { %844 = dma.hbm_to_vmem [thread:$0]  (!%p1337_p5), %s1347_s11, 256, %s205_s8, %s192_s9, %s1514_s4, %s1514_s4, %s1513_s27  }
  0x55   : > { %216 = sbr.rel (%p1285_p11) target bundleno = 537 (0x219), region = 32  ;;  %s218_s12 = sand.u32 (!%p1285_p11), 1, %s1149_s16  }
  0x56   : > { %s1373_s5 = sshll.u32 (!%p1285_p11), %s218_s12, 4  ;;  %s219_s25 = scalar_lea.sflag (!%p1285_p11), [#allocation3], %s218_s12 }
  0x57   : > { %s222_s28 = scalar_lea.vmem (!%p1285_p11), [#allocation2], %s1373_s5 }
  0x5a   : > { %1116 = dma.done.wait (%p1268_p3), %s219_s25, 256  }
  0x5b   : > { %1118 = vsyncadd (%p1268_p3), %s219_s25, 4294967040  ;;  %s227_s19 = sand.u32 1, %s1258_s23   ;;  %s231_s29 = scalar_lea.vmem [#allocation5], %s1373_s5 }
  0x5c   : > { %s228_s11 = scalar_lea.sflag [#allocation6], %s227_s19 }
  0x5d   : > { %1120 = dma.done.wait (%p1268_p3), %s228_s11, 256  }
  0x5e   : > { %1122 = vsyncadd (%p1268_p3), %s228_s11, 4294967040 }
  0x5f   : > { %1124 = dma.done.wait (%p57_p1), [#allocation6], 2048  }
  0x60   : > { %1126 = vsyncadd (%p57_p1), [#allocation6], 4294965248  ;;  %s260_s27 = sand.u32 1, %s1137_s13   ;;  %v280_v0 = vld [vmem:[#allocation7 + $0x78] sm:$0xff]  ;;  %v279_v1 = vld [vmem:[#allocation7 + $0x70] sm:$0xff]  ;;  %s1180_s23 = smov 64   ;;  %v483_v36 = vlaneseq }
  0x61   : > { %s1393_s4 = sshll.u32 %s260_s27, 3  ;;  %754 = vmatprep.subr.mxu0 %v280_v0  ;;  %789 = vmatprep.subr.mxu1 %v280_v0  ;;  %v278_v2 = vld [vmem:[#allocation7 + $0x68] sm:$0xff]  ;;  %v277_v3 = vld [vmem:[#allocation7 + $0x60] sm:$0xff]  ;;  %v276_v4 = vld [vmem:[#allocation7 + $0x58] sm:$0xff]  ;;  %s712_s26 = sshll.u32 %s1157_s18, 4  ;;  %v1181_v50 = vmov 0.0  }
  0x62   : > { %755 = vmatpush3.msra.mxu0 %v280_v0  ;;  %790 = vmatpush3.msra.mxu1 %v280_v0  ;;  %v275_v5 = vld [vmem:[#allocation7 + $0x50] sm:$0xff]  ;;  %v274_v6 = vld [vmem:[#allocation7 + $0x48] sm:$0xff]  ;;  %v273_v7 = vld [vmem:[#allocation7 + $0x40] sm:$0xff]  ;;  %s489_s24 = ssub.s32 64, %s712_s26  ;;  %v484_v37 = vand.u32 127, %v483_v36  ;;  %v1404_v38 = vshrl.u32 %v483_v36, 7 }
  0x63   : > { %756 = vmatprep.subr.mxu0 %v279_v1  ;;  %791 = vmatprep.subr.mxu1 %v279_v1  ;;  %v272_v8 = vld [vmem:[#allocation7 + $0x38] sm:$0xff]  ;;  %v271_v9 = vld [vmem:[#allocation7 + $0x30] sm:$0xff]  ;;  %v270_v10 = vld [vmem:[#allocation7 + $0x28] sm:$0xff]  ;;  %v491_v39 = vstv %s489_s24  ;;  %s262_s8 = scalar_lea.vmem [#allocation8], %s1393_s4  ;;  %p713_p1 = scmp.ne.s32.totalorder %s1157_s18, 0 }
  0x64   : > { %757 = vmatpush3.msra.mxu0 %v279_v1  ;;  %792 = vmatpush3.msra.mxu1 %v279_v1  ;;  %v269_v11 = vld [vmem:[#allocation7 + $0x20] sm:$0xff]  ;;  %v268_v12 = vld [vmem:[#allocation7 + $0x18] sm:$0xff]  ;;  %v267_v13 = vld [vmem:[#allocation7 + $0x10] sm:$0xff]  ;;  %vm490_vm0 = vcmp.lt.s32.totalorder %v484_v37, 56  ;;  %vm492_vm1 = vcmp.lt.s32.totalorder %v1404_v38, %v491_v39  ;;  %v487_v43 = vadd.s32 8, %v1404_v38  ;;  %vm545_vm13 = vcmp.eq.s32.totalorder %v1404_v38, 0 }
  0x65   : > { %758 = vmatprep.subr.mxu0 %v278_v2  ;;  %793 = vmatprep.subr.mxu1 %v278_v2  ;;  %v266_v14 = vld [vmem:[#allocation7 + $0x8] sm:$0xff]  ;;  %v265_v15 = vld [vmem:[#allocation7] sm:$0xff]  ;;  %vm494_vm2 = vmand %vm490_vm0, %vm492_vm1  ;;  %vm547_vm14 = vcmp.eq.s32.totalorder %v1404_v38, 1  ;;  %vm550_vm15 = vcmp.eq.s32.totalorder %v1404_v38, 2 }
  0x66   : > { %759 = vmatpush3.msra.mxu0 %v278_v2  ;;  %794 = vmatpush3.msra.mxu1 %v278_v2  ;;  %v281_v16 = vld [vmem:[%s222_s28] sm:$0xff]  ;;  %v282_v18 = vld [vmem:[%s222_s28 + $0x8] sm:$0xff]  ;;  %v496_v51 = vsel %vm494_vm2, 1.0, %v1181_v50  ;;  %vm1409_vm7 = vcmp.lt.s32.totalorder %v487_v43, %v491_v39 }
  0x67   : > { %760 = vmatprep.subr.mxu0 %v277_v3  ;;  %795 = vmatprep.subr.mxu1 %v277_v3  ;;  %v382_v17 = vld [vmem:[%s231_s29] sm:$0xff]  ;;  %v383_v19 = vld [vmem:[%s231_s29 + $0x8] sm:$0xff]  ;;  %vm495_vm11 = vmand %vm490_vm0, %vm1409_vm7 }
  0x68   : > { %761 = vmatpush3.msra.mxu0 %v277_v3  ;;  %796 = vmatpush3.msra.mxu1 %v277_v3 }
  0x69   : > { %762 = vmatprep.subr.mxu0 %v276_v4  ;;  %797 = vmatprep.subr.mxu1 %v276_v4 }
  0x6a   : > { %763 = vmatpush3.msra.mxu0 %v276_v4  ;;  %798 = vmatpush3.msra.mxu1 %v276_v4 }
  0x6b   : > { %764 = vmatprep.subr.mxu0 %v275_v5  ;;  %799 = vmatprep.subr.mxu1 %v275_v5 }
  0x6c   : > { %765 = vmatpush3.msra.mxu0 %v275_v5  ;;  %800 = vmatpush3.msra.mxu1 %v275_v5 }
  0x6d   : > { %766 = vmatprep.subr.mxu0 %v274_v6  ;;  %801 = vmatprep.subr.mxu1 %v274_v6 }
  0x6e   : > { %767 = vmatpush3.msra.mxu0 %v274_v6  ;;  %802 = vmatpush3.msra.mxu1 %v274_v6 }
  0x6f   : > { %768 = vmatprep.subr.mxu0 %v273_v7  ;;  %803 = vmatprep.subr.mxu1 %v273_v7 }
  0x70   : > { %769 = vmatpush3.msra.mxu0 %v273_v7  ;;  %804 = vmatpush3.msra.mxu1 %v273_v7  ;;  %v497_v7 = vsel %vm495_vm11, 1.0, %v1181_v50 }
  0x71   : > { %770 = vmatprep.subr.mxu0 %v272_v8  ;;  %805 = vmatprep.subr.mxu1 %v272_v8 }
  0x72   : > { %771 = vmatpush3.msra.mxu0 %v272_v8  ;;  %806 = vmatpush3.msra.mxu1 %v272_v8 }
  0x73   : > { %772 = vmatprep.subr.mxu0 %v271_v9  ;;  %807 = vmatprep.subr.mxu1 %v271_v9 }
  0x74   : > { %773 = vmatpush3.msra.mxu0 %v271_v9  ;;  %808 = vmatpush3.msra.mxu1 %v271_v9 }
  0x75   : > { %774 = vmatprep.subr.mxu0 %v270_v10  ;;  %809 = vmatprep.subr.mxu1 %v270_v10 }
  0x76   : > { %775 = vmatpush3.msra.mxu0 %v270_v10  ;;  %810 = vmatpush3.msra.mxu1 %v270_v10 }
  0x77   : > { %776 = vmatprep.subr.mxu0 %v269_v11  ;;  %811 = vmatprep.subr.mxu1 %v269_v11 }
  0x78   : > { %777 = vmatpush3.msra.mxu0 %v269_v11  ;;  %812 = vmatpush3.msra.mxu1 %v269_v11 }
  0x79   : > { %778 = vmatprep.subr.mxu0 %v268_v12  ;;  %813 = vmatprep.subr.mxu1 %v268_v12 }
  0x7a   : > { %779 = vmatpush3.msra.mxu0 %v268_v12  ;;  %814 = vmatpush3.msra.mxu1 %v268_v12 }
  0x7b   : > { %780 = vmatprep.subr.mxu0 %v267_v13  ;;  %815 = vmatprep.subr.mxu1 %v267_v13 }
  0x7c   : > { %781 = vmatpush3.msra.mxu0 %v267_v13  ;;  %816 = vmatpush3.msra.mxu1 %v267_v13 }
  0x7d   : > { %782 = vmatprep.subr.mxu0 %v266_v14  ;;  %817 = vmatprep.subr.mxu1 %v266_v14 }
  0x7e   : > { %783 = vmatpush3.msra.mxu0 %v266_v14  ;;  %818 = vmatpush3.msra.mxu1 %v266_v14 }
  0x7f   : > { %784 = vmatprep.subr.mxu0 %v265_v15  ;;  %819 = vmatprep.subr.mxu1 %v265_v15 }
  0x80   : > { %785 = vmatpush3.msra.mxu0 %v265_v15  ;;  %786 = vmatprep.mubr.f32.mxu0 %v281_v16 }
  0x81   : > { %820 = vmatpush3.msra.mxu1 %v265_v15  ;;  %821 = vmatprep.mubr.f32.mxu1 %v382_v17 }
  0x82   : > { %787 = vmatmul.mubr.f32.vlgmr.msra.gmra.mxu0 %v282_v18  ;;  %822 = vmatmul.mubr.f32.vlgmr.msra.gmra.mxu1 %v383_v19 }
 0x142   : > { %v788_v20 = vpop.f32.mrf.mxu0  ;;  %v823_v21 = vpop.f32.mrf.mxu1 }
 0x143   : > { %v359_v26 = vmul.f32 %v788_v20, %v788_v20  ;;  %v460_v27 = vmul.f32 %v823_v21, %v823_v21 }
 0x144   : > { %v349_v22 = vpop.f32.mrf.mxu0  ;;  %v450_v23 = vpop.f32.mrf.mxu1 }
 0x145   : > { %v358_v24 = vmul.f32 %v349_v22, %v349_v22  ;;  %v459_v25 = vmul.f32 %v450_v23, %v450_v23 }
 0x147   : > { %461 = vrot.lane.b32.xlu1 %v459_v25, %s1180_s23  ;;  %360 = vrot.lane.b32.xlu0 %v358_v24, %s1180_s23 }
 0x14b   : > { %463 = vrot.lane.b32.xlu1 %v460_v27, %s1180_s23  ;;  %362 = vrot.lane.b32.xlu0 %v359_v26, %s1180_s23 }
 0x1b9   : > { %v462_v28 = vpop.permute.xlu1 %461  ;;  %v361_v29 = vpop.permute.xlu0 %360 }
 0x1ba   : > { %v465_v30 = vadd.f32 %v462_v28, %v459_v25  ;;  %v364_v31 = vadd.f32 %v361_v29, %v358_v24 }
 0x1bc   : > { %947 = vrsqrt.f32 %v465_v30  ;;  %vm469_vm3 = vcmp.eq.f32.partialorder %v465_v30, inf  ;;  %v472_v44 = vand.u32 2147483648, %v465_v30  ;;  %vm471_vm4 = vcmp.eq.f32.partialorder %v465_v30, 0.0 }
 0x1bd   : > { %949 = vrsqrt.f32 %v364_v31  ;;  %v464_v32 = vpop.permute.xlu1 %463  ;;  %v363_v33 = vpop.permute.xlu0 %362  ;;  %vm368_vm5 = vcmp.eq.f32.partialorder %v364_v31, inf  ;;  %v371_v47 = vand.u32 2147483648, %v364_v31  ;;  %vm370_vm6 = vcmp.eq.f32.partialorder %v364_v31, 0.0 }
 0x1be   : > { %v466_v34 = vadd.f32 %v464_v32, %v460_v27  ;;  %v365_v35 = vadd.f32 %v363_v33, %v359_v26 }
 0x1c0   : > { %951 = vrsqrt.f32 %v466_v34  ;;  %vm476_vm8 = vcmp.eq.f32.partialorder %v466_v34, inf  ;;  %v479_v59 = vand.u32 2147483648, %v466_v34  ;;  %vm478_vm9 = vcmp.eq.f32.partialorder %v466_v34, 0.0 }
 0x1c1   : > { %953 = vrsqrt.f32 %v365_v35  ;;  %vm375_vm10 = vcmp.eq.f32.partialorder %v365_v35, inf  ;;  %v378_v0 = vand.u32 2147483648, %v365_v35  ;;  %vm377_vm12 = vcmp.eq.f32.partialorder %v365_v35, 0.0 }
 0x1c9   : > { %v948_v40 = vpop.eup %947 }
 0x1ca   : > { %v950_v41 = vpop.eup %949  ;;  %v468_v42 = vmul.f32 %v948_v40, %v465_v30 }
 0x1cb   : > { %v367_v45 = vmul.f32 %v950_v41, %v364_v31 }
 0x1cc   : > { %v470_v46 = vsel %vm469_vm3, %v465_v30, %v468_v42 }
 0x1cd   : > { %v952_v48 = vpop.eup %951  ;;  %v473_v49 = vsel %vm471_vm4, %v472_v44, %v470_v46  ;;  %v369_v52 = vsel %vm368_vm5, %v364_v31, %v367_v45 }
 0x1ce   : > { %v954_v53 = vpop.eup %953  ;;  %v481_v54 = vadd.f32 1e-07, %v473_v49  ;;  %v372_v55 = vsel %vm370_vm6, %v371_v47, %v369_v52  ;;  %v475_v56 = vmul.f32 %v952_v48, %v466_v34 }
 0x1cf   : > { %v380_v58 = vadd.f32 1e-07, %v372_v55  ;;  %v374_v60 = vmul.f32 %v954_v53, %v365_v35 }
 0x1d0   : > { %955 = vlog2.f32 %v481_v54  ;;  %v477_v61 = vsel %vm476_vm8, %v466_v34, %v475_v56 }
 0x1d1   : > { %v498_v62 = vsub.f32 %v380_v58, %v481_v54  ;;  %957 = vlog2.f32 %v380_v58  ;;  %v480_v63 = vsel %vm478_vm9, %v479_v59, %v477_v61  ;;  %v500_v1 = vadd.f32 %v481_v54, %v380_v58 }
 0x1d2   : > { %v482_v2 = vadd.f32 1e-07, %v480_v63  ;;  %v376_v3 = vsel %vm375_vm10, %v365_v35, %v374_v60 }
 0x1d3   : > { %v379_v4 = vsel %vm377_vm12, %v378_v0, %v376_v3  ;;  %v514_v6 = vmul.f32 %v498_v62, %v496_v51  ;;  %v525_v8 = vmul.f32 %v500_v1, %v496_v51 }
 0x1d4   : > { %959 = vlog2.f32 %v482_v2  ;;  %v381_v5 = vadd.f32 1e-07, %v379_v4 }
 0x1d5   : > { %v516_v13 = vmul.f32 %v514_v6, %v498_v62  ;;  %v527_v14 = vmul.f32 %v525_v8, %v500_v1 }
 0x1d6   : > { %v499_v9 = vsub.f32 %v381_v5, %v482_v2  ;;  %v501_v10 = vadd.f32 %v482_v2, %v381_v5  ;;  %961 = vlog2.f32 %v381_v5 }
 0x1d8   : > { %v515_v11 = vmul.f32 %v499_v9, %v497_v7  ;;  %v526_v12 = vmul.f32 %v501_v10, %v497_v7 }
 0x1da   : > { %v517_v15 = vmul.f32 %v515_v11, %v499_v9  ;;  %v528_v16 = vmul.f32 %v526_v12, %v501_v10 }
 0x1dc   : > { %v518_v17 = vadd.f32 %v517_v15, %v516_v13  ;;  %v529_v18 = vadd.f32 %v528_v16, %v527_v14 }
 0x1dd   : > { %v956_v19 = vpop.eup %955 }
 0x1de   : > { %v958_v20 = vpop.eup %957  ;;  %v507_v21 = vmul.f32 0.6931472, %v956_v19  ;;  %v519_v22 = vrot.slane %v518_v17, 4  ;;  %v530_v23 = vrot.slane %v529_v18, 4 }
 0x1df   : > { %v503_v24 = vmul.f32 0.6931472, %v958_v20 }
 0x1e0   : > { %v520_v28 = vadd.f32 %v519_v22, %v518_v17  ;;  %v531_v29 = vadd.f32 %v530_v23, %v529_v18 }
 0x1e1   : > { %v960_v25 = vpop.eup %959  ;;  %v510_v26 = vsub.f32 %v503_v24, %v507_v21 }
 0x1e2   : > { %v509_v27 = vmul.f32 0.6931472, %v960_v25  ;;  %v521_v34 = vrot.slane %v520_v28, 2  ;;  %v532_v35 = vrot.slane %v531_v29, 2 }
 0x1e3   : > { %v962_v30 = vpop.eup %961  ;;  %v512_v32 = vand.u32 2147483647, %v510_v26 }
 0x1e4   : > { %v505_v31 = vmul.f32 0.6931472, %v962_v30  ;;  %v522_v39 = vadd.f32 %v521_v34, %v520_v28  ;;  %v533_v40 = vadd.f32 %v532_v35, %v531_v29 }
 0x1e5   : > { %v536_v37 = vmul.f32 %v512_v32, %v496_v51 }
 0x1e6   : > { %v511_v33 = vsub.f32 %v505_v31, %v509_v27  ;;  %v523_v43 = vrot.slane %v522_v39, 1  ;;  %v534_v44 = vrot.slane %v533_v40, 1 }
 0x1e8   : > { %v513_v36 = vand.u32 2147483647, %v511_v33  ;;  %v524_v47 = vadd.f32 %v523_v43, %v522_v39  ;;  %v535_v48 = vadd.f32 %v534_v44, %v533_v40 }
 0x1ea   : > { %v537_v41 = vmul.f32 %v513_v36, %v497_v7  ;;  %v546_v53 = vsel %vm545_vm13, %v524_v47, 0.0  ;;  %v548_v51 = vsel %vm547_vm14, %v535_v48, 0.0 }
 0x1eb   : > { %v549_v55 = vadd.f32 %v548_v51, %v546_v53 }
 0x1ec   : > { %v538_v42 = vadd.f32 %v537_v41, %v536_v37 }
 0x1ee   : > { %v539_v45 = vrot.slane %v538_v42, 4 }
 0x1f0   : > { %v540_v46 = vadd.f32 %v539_v45, %v538_v42 }
 0x1f2   : > { %v541_v49 = vrot.slane %v540_v46, 2 }
 0x1f4   : > { %v542_v50 = vadd.f32 %v541_v49, %v540_v46 }
 0x1f6   : > { %v543_v52 = vrot.slane %v542_v50, 1 }
 0x1f7   : > { %556 = sbr.rel (%p713_p1) target bundleno = 510 (0x1fe), region = 48 }
 0x1f8   : > { %v544_v54 = vadd.f32 %v543_v52, %v542_v50 }
 0x1fa   : > { %v551_v56 = vsel %vm550_vm15, %v544_v54, 0.0 }
 0x1fb   : > { %v552_v57 = vadd.f32 %v551_v56, %v549_v55 }
 0x1fc   : > { %v1182_v58 = vmov 0.0  }
 0x1fd   : > { %557 = vst [vmem:[%s262_s8] sm:$0xff] %v1182_v58 }
 0x1fe PF: > { %s1517_s15 = sld [smem:[#allocation14_spill]]  ;;  %s575_s5 = sshll.u32 %s262_s8, 4  ;;  %s576_s5 = int_to_ptr.vmem [resolvable:$true] %s575_s5 }
 0x1ff   : > { %s1518_s9 = sld [smem:[#allocation15_spill]]  ;;  %s562_s18 = scalar_lea.sflag [#allocation4], %s260_s27 }
 0x200   : > { %s1519_s30 = sld [smem:[#allocation20_spill]]  ;;  %s1045_s25 = scalar_lea.vmem %s576_s5, 128 }
 0x201   : > { %p1046_p3 = scmp.ne.s32.totalorder %s576_s5, %s1045_s25  ;;  %s1183_s28 = smov [#allocation8]  }
 0x202   : > { %s1049_s19 = sshll.u32 %s1183_s28, 4  ;;  %s1050_s19 = int_to_ptr.vmem [resolvable:$false] %s1049_s19 }
 0x203   : > { %s1051_s11 = scalar_lea.vmem %s1050_s19, 256  ;;  %p1052_p0 = scmp.lt.s32.totalorder %s576_s5, %s1050_s19 }
 0x204   : > { %v558_v59 = vld [vmem:[%s262_s8] sm:$0xff]  ;;  %s715_s6 = sshll.u32 %s1517_s15, 7  ;;  %p1053_p13 = scmp.lt.s32.totalorder %s1051_s11, %s1045_s25 }
 0x205   : > { %v559_v60 = vadd.f32 %v558_v59, %v552_v57  ;;  %p1520_p11 = scmp.ne.s32.totalorder %s1518_s9, 0 }
 0x206   : > { %s1425_s12 = scalar_lea.hbm %s1519_s30, %s715_s6  ;;  %p1054_p2 = por %p1053_p13, %p1052_p0 }
 0x207   : > { %560 = vst [vmem:[%s262_s8] sm:$0xff] %v559_v60  ;;  %p1047_p5 = pnand %p1046_p3, %p1520_p11 }
 0x209   : > { %p1048_p6 = pneg %p1047_p5 }
 0x20b   : > { %p1055_p4 = pnand %p1054_p2, %p1048_p6 }
 0x20d   : > { %1058 = shalt.err (!%p1055_p4)
}
 0x20e   : > { %s1059_s29 = scalar_lea.hbm %s1425_s12, 128  ;;  %s1063_s23 = scalar_lea.hbm %s1519_s30, 256 }
 0x20f   : > { %p1060_p8 = scmp.ne.s32.totalorder %s1425_s12, %s1059_s29  ;;  %p1064_p10 = scmp.lt.s32.totalorder %s1425_s12, %s1519_s30 }
 0x210   : > { %p1065_p12 = scmp.lt.s32.totalorder %s1063_s23, %s1059_s29 }
 0x211   : > { %p1061_p7 = pnand %p1060_p8, %p1520_p11 }
 0x212   : > { %p1066_p1 = por %p1065_p12, %p1064_p10 }
 0x213   : > { %p1062_p9 = pneg %p1061_p7 }
 0x215   : > { %p1067_p3 = pnand %p1066_p1, %p1062_p9 }
 0x217   : > { %1070 = shalt.err (!%p1067_p3)
}
 0x218   : > { %832 = dma.vmem_to_hbm [thread:$0]  (%p1520_p11), %s576_s5, 128, %s1425_s12, %s562_s18  }
 0x219 PF: > { %s1521_s8 = sld [smem:[#allocation13_spill]]  ;;  %p852_p5 = scmp.ge.s32.totalorder %s1173_s22, 2 }
 0x21a   : > { %s1522_s15 = sld [smem:[#allocation16_spill]] }
 0x21f   : > { %s587_s6 = sand.u32 1, %s1521_s8  }
 0x220   : > { %p1523_p6 = scmp.ne.s32.totalorder %s1522_s15, 0  ;;  %s588_s3 = scalar_lea.sflag [#allocation4], %s587_s6 }
 0x222   : > { %p846_p0 = pnand %p852_p5, %p1523_p6 }
 0x224   : > { %p847_p13 = pneg %p846_p0 }
 0x226   : > { %1128 = dma.done.wait (%p847_p13), %s588_s3, 128  }
 0x227   : > { %1130 = vsyncadd (%p847_p13), %s588_s3, 4294967168  ;;  %s22_s22 = sadd.s32 1, %s1173_s22   ;;  %s1524_s9 = sld [smem:[#allocation17_spill]] }
 0x228   : > { %p19_p2 = scmp.ge.s32.totalorder %s22_s22, 10   ;;  %s1525_s10 = sld [smem:[#allocation18_spill]] }
 0x229   : > { %s1526_s12 = smov %s1137_s13  ;;  %s1527_s13 = smov %s1141_s14 }
 0x22a   : > { %s1528_s14 = smov %s1326_s7  ;;  %s1529_s15 = smov %s1149_s16 }
 0x22b   : > { %s1530_s16 = smov %s1153_s17  ;;  %s1531_s17 = smov %s1329_s2 }
 0x22c   : > { %s1532_s18 = smov %s1165_s20  ;;  %s1533_s19 = smov %s1169_s21 }
 0x22d   : > { %s1534_s20 = smov %s1524_s9  ;;  %21 = sbr.rel (!%p19_p2) target bundleno = 14 (0xe), region = 98 }
 0x22e   : > { %s1535_s21 = smov %s1525_s10 }
 0x232   :  { %593 = vsyncpa [#allocation3], 1 }
 0x233   :  { %595 = vsyncpa [#allocation3 + $0x1], 1 }
 0x234   :  { %596 = vsyncpa [#allocation6], 1 }
 0x235   :  { %598 = vsyncpa [#allocation6 + $0x1], 1 }
 0x236   :  { %599 = vsyncpa [#allocation4], 1 }
 0x237   :  { %601 = vsyncpa [#allocation4 + $0x1], 1 }

</bundles_post_ra>
